<compile_context>
chip_gen: v7x
topology: tpu7x:2x2x1
jax: 0.10.0
libtpu: 0.0.40
codegen_flags: <defaults>
</compile_context>

<pallas_src>
import jax
import jax.numpy as jnp
from jax.experimental import pallas as pl
from jax.experimental.pallas import tpu as pltpu

LANE = 128


# --------------------------------- kernel ---------------------------------
def _hyp_exp_kernel(x_ref, v_ref, o_ref):
    d = x_ref.shape[0]

    # Each Minkowski component is a dense (tile_rows, 128) f32 slab.
    x = [x_ref[c].astype(jnp.float32) for c in range(d)]
    v = [v_ref[c].astype(jnp.float32) for c in range(d)]

    def spatial_dot(a, b):
        # sum_{i>=1} a_i * b_i   (pure VPU, full lane/sublane density)
        s = a[1] * b[1]
        for i in range(2, d):
            s = s + a[i] * b[i]
        return s

    def mink_inner(a, b, a_sp, b_sp, space_inner):
        # Minkowski inner product with the module's space-space special case.
        is_space_space = (a_sp > a[0] * a[0]) & (b_sp > b[0] * b[0])
        return jnp.where(is_space_space, space_inner, space_inner - a[0] * b[0])

    def project_time(a0, a_sp):
        # time component of project_to_hyperboloid (spatial components unchanged)
        space_norm = jnp.sqrt(a_sp)
        return jnp.where(space_norm > jnp.abs(a0),
                         0.9 * space_norm,
                         jnp.sqrt(1.0 + a_sp))

    # ---- x -> hyperboloid ----
    x_sp = spatial_dot(x, x)
    xh = [project_time(x[0], x_sp)] + list(x[1:])
    xh_sp = x_sp                                   # spatial part unchanged

    # ---- project_to_tangent(xh, v) ----
    # project_to_hyperboloid is idempotent, so reuse xh instead of re-projecting.
    inner_xx = mink_inner(xh, xh, xh_sp, xh_sp, xh_sp)
    inv_nx = 1.0 / jnp.sqrt(jnp.abs(inner_xx))
    an = [c * inv_nx for c in xh]
    an_sp = spatial_dot(an, an)
    v_sp = spatial_dot(v, v)
    inner_xv = mink_inner(an, v, an_sp, v_sp, spatial_dot(an, v))
    v_proj = [v[i] + inner_xv * an[i] for i in range(d)]
    vp_sp = spatial_dot(v_proj, v_proj)
    inv_spn = 1.0 / jnp.maximum(jnp.sqrt(vp_sp), 1e-7)
    vt_s = [v_proj[i] * inv_spn for i in range(1, d)]
    space_inner = an[1] * vt_s[0]
    for i in range(2, d):
        space_inner = space_inner + an[i] * vt_s[i - 1]
    t0 = space_inner / an[0]                       # exact divide (an[0] >= 0.9)
    vt = [t0] + vt_s

    # ---- Minkowski norm of the tangent vector ----
    vt_sp = spatial_dot(vt, vt)
    v_norm = jnp.sqrt(jnp.maximum(
        mink_inner(vt, vt, vt_sp, vt_sp, vt_sp), 1e-12))

    # v_norm >= 1e-6 > 1e-7 always (the 1e-12 clamp), so torch's all(v_norm<=1e-7)
    # early return never fires; always take the exponential-map branch.
    vn = jnp.clip(v_norm, 1e-7, 5.0)
    e_p = jnp.exp(vn)
    e_m = jnp.exp(-vn)
    cosh = 0.5 * (e_p + e_m)
    # sinh(vn)/vn without catastrophic cancellation for small vn (vn can be 1e-6
    # when mink_inner(vt,vt) clamps at 1e-12).
    vn2 = vn * vn
    sinhc_small = 1.0 + vn2 * (1.0 / 6.0) * (
        1.0 + vn2 * (1.0 / 20.0) * (1.0 + vn2 * (1.0 / 42.0)))
    sinhc_big = (0.5 * (e_p - e_m)) / vn
    sinhc = jnp.where(vn < 0.5, sinhc_small, sinhc_big)

    result = [cosh * xh[i] + sinhc * vt[i] for i in range(d)]

    # ---- final projection back onto the hyperboloid + lane-dense stores ----
    r_sp = spatial_dot(result, result)
    o_ref[0] = project_time(result[0], r_sp).astype(o_ref.dtype)
    for c in range(1, d):
        o_ref[c] = result[c].astype(o_ref.dtype)


# ------------------------- pure-JAX reference (mirrors torch) -------------------------
def _time(a):
    return a[..., 0]


def _mink_inner_ref(a, b):
    ti = _time(a) * _time(b)
    si = jnp.sum(a[..., 1:] * b[..., 1:], axis=-1)
    asp = jnp.sum(a[..., 1:] ** 2, axis=-1)
    bsp = jnp.sum(b[..., 1:] ** 2, axis=-1)
    iss = (asp > _time(a) ** 2) & (bsp > _time(b) ** 2)
    return jnp.where(iss, si, -ti + si)


def _proj_hyp_ref(a):
    sn = jnp.sqrt(jnp.sum(a[..., 1:] ** 2, axis=-1))
    t = jnp.where(sn > jnp.abs(_time(a)), sn * 0.9, jnp.sqrt(1.0 + sn ** 2))
    return jnp.concatenate([t[..., None], a[..., 1:]], axis=-1)


def _proj_tan_ref(x, v):
    xn = _proj_hyp_ref(x)
    xn = xn / jnp.sqrt(jnp.abs(_mink_inner_ref(xn, xn)))[..., None]
    ixv = _mink_inner_ref(xn, v)
    vp = v + ixv[..., None] * xn
    sn = jnp.maximum(jnp.sqrt(jnp.sum(vp[..., 1:] ** 2, axis=-1, keepdims=True)), 1e-7)
    sp = vp[..., 1:] / sn
    si = jnp.sum(xn[..., 1:] * sp, axis=-1)
    t0 = si / xn[..., 0]
    return jnp.concatenate([t0[..., None], sp], axis=-1)


def _ref_forward(x, v):
    xh = _proj_hyp_ref(x)
    vt = _proj_tan_ref(xh, v)
    vnorm = jnp.sqrt(jnp.maximum(_mink_inner_ref(vt, vt), 1e-12))
    all_small = jnp.all(vnorm <= 1e-7)             # always False (vnorm >= 1e-6)
    res_small = xh + vt
    vn = jnp.clip(vnorm, 1e-7, 5.0)
    cosh, sinh = jnp.cosh(vn), jnp.sinh(vn)
    res_big = cosh[..., None] * xh + sinh[..., None] * (vt / vn[..., None])
    result = jnp.where(all_small, res_small, res_big)
    return _proj_hyp_ref(result)


# --------------------------------- wrapper ---------------------------------
def _ceil_to(a, b):
    return -(-a // b) * b


def hyperbolic_exponential(x, v, *, max_tile_rows=512):
    """Pallas implementation of HyperbolicExponential.forward(x, v)."""
    assert x.shape == v.shape
    orig_shape = x.shape
    d = orig_shape[-1]
    assert d >= 2, "hyperboloid model needs at least one spatial dimension"
    out_dtype = x.dtype

    x2 = x.reshape(-1, d)
    v2 = v.reshape(-1, d)
    n = x2.shape[0]

    # Lane-major layout: (d, rows_padded, 128); rows aligned to the dtype's sublane tiling.
    itemsize = jnp.dtype(out_dtype).itemsize
    sub = max(8, 32 // itemsize)               # 8 for f32, 16 for bf16
    rows = -(-n // LANE)
    rows_a = _ceil_to(rows, sub)

    tile_r = min(max_tile_rows, rows_a)
    # Keep at least 2 grid steps when alignment allows, so ("parallel",) can use
    # both TensorCores on v7x even for small/medium inputs.
    if rows_a >= 2 * sub:
        tile_r = min(tile_r, max(sub, (rows_a // 2) // sub * sub))
    tile_r = max(sub, (tile_r // sub) * sub)
    rows_p = _ceil_to(rows_a, tile_r)
    n_pad = rows_p * LANE

    def to_lane_major(a2):
        at = jnp.transpose(a2, (1, 0))                       # (d, n)
        at = jnp.pad(at, ((0, 0), (0, n_pad - n)))           # zero padding stays finite
        return at.reshape(d, rows_p, LANE)

    xt = to_lane_major(x2)
    vt = to_lane_major(v2)

    grid = (rows_p // tile_r,)
    blk = (d, tile_r, LANE)

    # Explicit VMEM budget: double-buffered operand/output blocks + live f32 temporaries.
    est = (3 * 2 * d * tile_r * LANE * itemsize          # blocks, 2-deep pipeline
           + 28 * tile_r * LANE * 4                      # in-body f32 slabs
           + (2 << 20))
    vmem_limit = int(min(max(est, 32 << 20), 48 << 20))

    out = pl.pallas_call(
        _hyp_exp_kernel,
        out_shape=jax.ShapeDtypeStruct((d, rows_p, LANE), out_dtype),
        grid=grid,
        in_specs=[
            pl.BlockSpec(blk, lambda i: (0, i, 0)),
            pl.BlockSpec(blk, lambda i: (0, i, 0)),
        ],
        out_specs=pl.BlockSpec(blk, lambda i: (0, i, 0)),
        compiler_params=pltpu.CompilerParams(
            dimension_semantics=("parallel",),
            vmem_limit_bytes=vmem_limit,
        ),
    )(xt, vt)

    out2 = out.reshape(d, n_pad)[:, :n]
    return jnp.transpose(out2, (1, 0)).reshape(orig_shape)


# ----------------------------------- test -----------------------------------
if __name__ == "__main__":
    # HyperbolicExponential(dim=4); inputs x, v with shape (..., dim).
    batch, seq, dim = 2, 8, 4
    key = jax.random.PRNGKey(0)
    kx, kv = jax.random.split(key)
    x = jax.random.normal(kx, (batch, seq, dim), dtype=jnp.float32)
    v = jax.random.normal(kv, (batch, seq, dim), dtype=jnp.float32)

    out = jax.block_until_ready(hyperbolic_exponential(x, v))
    ref = _ref_forward(x, v)
    assert out.shape == (batch, seq, dim)
    assert bool(jnp.all(jnp.isfinite(out)))
    assert jnp.allclose(out, ref, rtol=5e-4, atol=5e-5), "mismatch vs JAX reference"

    # Exercise the multi-tile (grid > 1) pipelined path with a small forced tile.
    kx2, kv2 = jax.random.split(jax.random.PRNGKey(1))
    x_big = jax.random.normal(kx2, (4, 300, dim), dtype=jnp.float32)
    v_big = jax.random.normal(kv2, (4, 300, dim), dtype=jnp.float32)
    out_big = jax.block_until_ready(
        hyperbolic_exponential(x_big, v_big, max_tile_rows=8))
    ref_big = _ref_forward(x_big, v_big)
    assert jnp.allclose(out_big, ref_big, rtol=5e-4, atol=5e-5), "mismatch (multi-tile)"

    print("KERNEL_OK")
</pallas_src>

<mosaic_0001>
module attributes {stable_mosaic.version = 11 : i64} {
  func.func @_hyp_exp_kernel(%arg0: i32, %arg1: memref<4x8x128xf32, #tpu.memory_space<vmem>>, %arg2: memref<4x8x128xf32, #tpu.memory_space<vmem>>, %arg3: memref<4x8x128xf32, #tpu.memory_space<vmem>>) attributes {dimension_semantics = [#tpu.dimension_semantics<parallel>], iteration_bounds = array<i64: 1>, scalar_prefetch = 0 : i64, scratch_operands = 0 : i64, tpu.core_type = #tpu.core_type<tc>, window_params = [{transform_indices = @transform_0, window_bounds = array<i64: 4, 8, 128>}, {transform_indices = @transform_1, window_bounds = array<i64: 4, 8, 128>}, {transform_indices = @transform_2, window_bounds = array<i64: 4, 8, 128>}]} {
    %c0 = arith.constant 0 : index
    %c0_0 = arith.constant 0 : index
    %c0_1 = arith.constant 0 : index
    %0 = vector.load %arg1[%c0, %c0_0, %c0_1] : memref<4x8x128xf32, #tpu.memory_space<vmem>>, vector<1x8x128xf32>
    %1 = vector.shape_cast %0 : vector<1x8x128xf32> to vector<8x128xf32>
    %c1 = arith.constant 1 : index
    %c0_2 = arith.constant 0 : index
    %c0_3 = arith.constant 0 : index
    %2 = vector.load %arg1[%c1, %c0_2, %c0_3] : memref<4x8x128xf32, #tpu.memory_space<vmem>>, vector<1x8x128xf32>
    %3 = vector.shape_cast %2 : vector<1x8x128xf32> to vector<8x128xf32>
    %c2 = arith.constant 2 : index
    %c0_4 = arith.constant 0 : index
    %c0_5 = arith.constant 0 : index
    %4 = vector.load %arg1[%c2, %c0_4, %c0_5] : memref<4x8x128xf32, #tpu.memory_space<vmem>>, vector<1x8x128xf32>
    %5 = vector.shape_cast %4 : vector<1x8x128xf32> to vector<8x128xf32>
    %c3 = arith.constant 3 : index
    %c0_6 = arith.constant 0 : index
    %c0_7 = arith.constant 0 : index
    %6 = vector.load %arg1[%c3, %c0_6, %c0_7] : memref<4x8x128xf32, #tpu.memory_space<vmem>>, vector<1x8x128xf32>
    %7 = vector.shape_cast %6 : vector<1x8x128xf32> to vector<8x128xf32>
    %c0_8 = arith.constant 0 : index
    %c0_9 = arith.constant 0 : index
    %c0_10 = arith.constant 0 : index
    %8 = vector.load %arg2[%c0_8, %c0_9, %c0_10] : memref<4x8x128xf32, #tpu.memory_space<vmem>>, vector<1x8x128xf32>
    %9 = vector.shape_cast %8 : vector<1x8x128xf32> to vector<8x128xf32>
    %c1_11 = arith.constant 1 : index
    %c0_12 = arith.constant 0 : index
    %c0_13 = arith.constant 0 : index
    %10 = vector.load %arg2[%c1_11, %c0_12, %c0_13] : memref<4x8x128xf32, #tpu.memory_space<vmem>>, vector<1x8x128xf32>
    %11 = vector.shape_cast %10 : vector<1x8x128xf32> to vector<8x128xf32>
    %c2_14 = arith.constant 2 : index
    %c0_15 = arith.constant 0 : index
    %c0_16 = arith.constant 0 : index
    %12 = vector.load %arg2[%c2_14, %c0_15, %c0_16] : memref<4x8x128xf32, #tpu.memory_space<vmem>>, vector<1x8x128xf32>
    %13 = vector.shape_cast %12 : vector<1x8x128xf32> to vector<8x128xf32>
    %c3_17 = arith.constant 3 : index
    %c0_18 = arith.constant 0 : index
    %c0_19 = arith.constant 0 : index
    %14 = vector.load %arg2[%c3_17, %c0_18, %c0_19] : memref<4x8x128xf32, #tpu.memory_space<vmem>>, vector<1x8x128xf32>
    %15 = vector.shape_cast %14 : vector<1x8x128xf32> to vector<8x128xf32>
    %16 = arith.mulf %3, %3 : vector<8x128xf32>
    %17 = arith.mulf %5, %5 : vector<8x128xf32>
    %18 = arith.addf %16, %17 : vector<8x128xf32>
    %19 = arith.mulf %7, %7 : vector<8x128xf32>
    %20 = arith.addf %18, %19 : vector<8x128xf32>
    %21 = math.sqrt %20 : vector<8x128xf32>
    %22 = math.absf %1 : vector<8x128xf32>
    %23 = arith.cmpf ogt, %21, %22 : vector<8x128xf32>
    %cst = arith.constant 0.899999976 : f32
    %24 = vector.broadcast %cst : f32 to vector<8x128xf32>
    %25 = arith.mulf %24, %21 : vector<8x128xf32>
    %cst_20 = arith.constant 1.000000e+00 : f32
    %26 = vector.broadcast %cst_20 : f32 to vector<8x128xf32>
    %27 = arith.addf %26, %20 : vector<8x128xf32>
    %28 = math.sqrt %27 : vector<8x128xf32>
    %29 = arith.select %23, %25, %28 : vector<8x128xi1>, vector<8x128xf32>
    %30 = arith.mulf %29, %29 : vector<8x128xf32>
    %31 = arith.cmpf ogt, %20, %30 : vector<8x128xf32>
    %32 = arith.mulf %29, %29 : vector<8x128xf32>
    %33 = arith.cmpf ogt, %20, %32 : vector<8x128xf32>
    %34 = arith.andi %31, %33 : vector<8x128xi1>
    %35 = arith.mulf %29, %29 : vector<8x128xf32>
    %36 = arith.subf %20, %35 : vector<8x128xf32>
    %37 = arith.select %34, %20, %36 : vector<8x128xi1>, vector<8x128xf32>
    %38 = math.absf %37 : vector<8x128xf32>
    %39 = math.sqrt %38 : vector<8x128xf32>
    %cst_21 = arith.constant 1.000000e+00 : f32
    %40 = vector.broadcast %cst_21 : f32 to vector<8x128xf32>
    %41 = arith.divf %40, %39 : vector<8x128xf32>
    %42 = arith.mulf %29, %41 : vector<8x128xf32>
    %43 = arith.mulf %3, %41 : vector<8x128xf32>
    %44 = arith.mulf %5, %41 : vector<8x128xf32>
    %45 = arith.mulf %7, %41 : vector<8x128xf32>
    %46 = arith.mulf %43, %43 : vector<8x128xf32>
    %47 = arith.mulf %44, %44 : vector<8x128xf32>
    %48 = arith.addf %46, %47 : vector<8x128xf32>
    %49 = arith.mulf %45, %45 : vector<8x128xf32>
    %50 = arith.addf %48, %49 : vector<8x128xf32>
    %51 = arith.mulf %11, %11 : vector<8x128xf32>
    %52 = arith.mulf %13, %13 : vector<8x128xf32>
    %53 = arith.addf %51, %52 : vector<8x128xf32>
    %54 = arith.mulf %15, %15 : vector<8x128xf32>
    %55 = arith.addf %53, %54 : vector<8x128xf32>
    %56 = arith.mulf %43, %11 : vector<8x128xf32>
    %57 = arith.mulf %44, %13 : vector<8x128xf32>
    %58 = arith.addf %56, %57 : vector<8x128xf32>
    %59 = arith.mulf %45, %15 : vector<8x128xf32>
    %60 = arith.addf %58, %59 : vector<8x128xf32>
    %61 = arith.mulf %42, %42 : vector<8x128xf32>
    %62 = arith.cmpf ogt, %50, %61 : vector<8x128xf32>
    %63 = arith.mulf %9, %9 : vector<8x128xf32>
    %64 = arith.cmpf ogt, %55, %63 : vector<8x128xf32>
    %65 = arith.andi %62, %64 : vector<8x128xi1>
    %66 = arith.mulf %42, %9 : vector<8x128xf32>
    %67 = arith.subf %60, %66 : vector<8x128xf32>
    %68 = arith.select %65, %60, %67 : vector<8x128xi1>, vector<8x128xf32>
    %69 = arith.mulf %68, %43 : vector<8x128xf32>
    %70 = arith.addf %11, %69 : vector<8x128xf32>
    %71 = arith.mulf %68, %44 : vector<8x128xf32>
    %72 = arith.addf %13, %71 : vector<8x128xf32>
    %73 = arith.mulf %68, %45 : vector<8x128xf32>
    %74 = arith.addf %15, %73 : vector<8x128xf32>
    %75 = arith.mulf %70, %70 : vector<8x128xf32>
    %76 = arith.mulf %72, %72 : vector<8x128xf32>
    %77 = arith.addf %75, %76 : vector<8x128xf32>
    %78 = arith.mulf %74, %74 : vector<8x128xf32>
    %79 = arith.addf %77, %78 : vector<8x128xf32>
    %80 = math.sqrt %79 : vector<8x128xf32>
    %cst_22 = arith.constant 1.000000e-07 : f32
    %81 = vector.broadcast %cst_22 : f32 to vector<8x128xf32>
    %82 = arith.maximumf %80, %81 : vector<8x128xf32>
    %cst_23 = arith.constant 1.000000e+00 : f32
    %83 = vector.broadcast %cst_23 : f32 to vector<8x128xf32>
    %84 = arith.divf %83, %82 : vector<8x128xf32>
    %85 = arith.mulf %70, %84 : vector<8x128xf32>
    %86 = arith.mulf %72, %84 : vector<8x128xf32>
    %87 = arith.mulf %74, %84 : vector<8x128xf32>
    %88 = arith.mulf %43, %85 : vector<8x128xf32>
    %89 = arith.mulf %44, %86 : vector<8x128xf32>
    %90 = arith.addf %88, %89 : vector<8x128xf32>
    %91 = arith.mulf %45, %87 : vector<8x128xf32>
    %92 = arith.addf %90, %91 : vector<8x128xf32>
    %93 = arith.divf %92, %42 : vector<8x128xf32>
    %94 = arith.mulf %85, %85 : vector<8x128xf32>
    %95 = arith.mulf %86, %86 : vector<8x128xf32>
    %96 = arith.addf %94, %95 : vector<8x128xf32>
    %97 = arith.mulf %87, %87 : vector<8x128xf32>
    %98 = arith.addf %96, %97 : vector<8x128xf32>
    %99 = arith.mulf %93, %93 : vector<8x128xf32>
    %100 = arith.cmpf ogt, %98, %99 : vector<8x128xf32>
    %101 = arith.mulf %93, %93 : vector<8x128xf32>
    %102 = arith.cmpf ogt, %98, %101 : vector<8x128xf32>
    %103 = arith.andi %100, %102 : vector<8x128xi1>
    %104 = arith.mulf %93, %93 : vector<8x128xf32>
    %105 = arith.subf %98, %104 : vector<8x128xf32>
    %106 = arith.select %103, %98, %105 : vector<8x128xi1>, vector<8x128xf32>
    %cst_24 = arith.constant 9.99999996E-13 : f32
    %107 = vector.broadcast %cst_24 : f32 to vector<8x128xf32>
    %108 = arith.maximumf %106, %107 : vector<8x128xf32>
    %109 = math.sqrt %108 : vector<8x128xf32>
    %cst_25 = arith.constant 1.000000e-07 : f32
    %cst_26 = arith.constant 5.000000e+00 : f32
    %110 = vector.broadcast %cst_25 : f32 to vector<8x128xf32>
    %111 = arith.maximumf %110, %109 : vector<8x128xf32>
    %112 = vector.broadcast %cst_26 : f32 to vector<8x128xf32>
    %113 = arith.minimumf %112, %111 : vector<8x128xf32>
    %114 = math.exp %113 : vector<8x128xf32>
    %cst_27 = arith.constant 0.000000e+00 : f32
    %115 = vector.broadcast %cst_27 : f32 to vector<8x128xf32>
    %116 = arith.subf %115, %113 : vector<8x128xf32>
    %117 = math.exp %116 : vector<8x128xf32>
    %118 = arith.addf %114, %117 : vector<8x128xf32>
    %cst_28 = arith.constant 5.000000e-01 : f32
    %119 = vector.broadcast %cst_28 : f32 to vector<8x128xf32>
    %120 = arith.mulf %119, %118 : vector<8x128xf32>
    %121 = arith.mulf %113, %113 : vector<8x128xf32>
    %cst_29 = arith.constant 0.166666672 : f32
    %122 = vector.broadcast %cst_29 : f32 to vector<8x128xf32>
    %123 = arith.mulf %121, %122 : vector<8x128xf32>
    %cst_30 = arith.constant 5.000000e-02 : f32
    %124 = vector.broadcast %cst_30 : f32 to vector<8x128xf32>
    %125 = arith.mulf %121, %124 : vector<8x128xf32>
    %cst_31 = arith.constant 0.0238095243 : f32
    %126 = vector.broadcast %cst_31 : f32 to vector<8x128xf32>
    %127 = arith.mulf %121, %126 : vector<8x128xf32>
    %cst_32 = arith.constant 1.000000e+00 : f32
    %128 = vector.broadcast %cst_32 : f32 to vector<8x128xf32>
    %129 = arith.addf %128, %127 : vector<8x128xf32>
    %130 = arith.mulf %125, %129 : vector<8x128xf32>
    %cst_33 = arith.constant 1.000000e+00 : f32
    %131 = vector.broadcast %cst_33 : f32 to vector<8x128xf32>
    %132 = arith.addf %131, %130 : vector<8x128xf32>
    %133 = arith.mulf %123, %132 : vector<8x128xf32>
    %cst_34 = arith.constant 1.000000e+00 : f32
    %134 = vector.broadcast %cst_34 : f32 to vector<8x128xf32>
    %135 = arith.addf %134, %133 : vector<8x128xf32>
    %136 = arith.subf %114, %117 : vector<8x128xf32>
    %cst_35 = arith.constant 5.000000e-01 : f32
    %137 = vector.broadcast %cst_35 : f32 to vector<8x128xf32>
    %138 = arith.mulf %137, %136 : vector<8x128xf32>
    %139 = arith.divf %138, %113 : vector<8x128xf32>
    %cst_36 = arith.constant 5.000000e-01 : f32
    %140 = vector.broadcast %cst_36 : f32 to vector<8x128xf32>
    %141 = arith.cmpf olt, %113, %140 : vector<8x128xf32>
    %142 = arith.select %141, %135, %139 : vector<8x128xi1>, vector<8x128xf32>
    %143 = arith.mulf %120, %29 : vector<8x128xf32>
    %144 = arith.mulf %142, %93 : vector<8x128xf32>
    %145 = arith.addf %143, %144 : vector<8x128xf32>
    %146 = arith.mulf %120, %3 : vector<8x128xf32>
    %147 = arith.mulf %142, %85 : vector<8x128xf32>
    %148 = arith.addf %146, %147 : vector<8x128xf32>
    %149 = arith.mulf %120, %5 : vector<8x128xf32>
    %150 = arith.mulf %142, %86 : vector<8x128xf32>
    %151 = arith.addf %149, %150 : vector<8x128xf32>
    %152 = arith.mulf %120, %7 : vector<8x128xf32>
    %153 = arith.mulf %142, %87 : vector<8x128xf32>
    %154 = arith.addf %152, %153 : vector<8x128xf32>
    %155 = arith.mulf %148, %148 : vector<8x128xf32>
    %156 = arith.mulf %151, %151 : vector<8x128xf32>
    %157 = arith.addf %155, %156 : vector<8x128xf32>
    %158 = arith.mulf %154, %154 : vector<8x128xf32>
    %159 = arith.addf %157, %158 : vector<8x128xf32>
    %160 = math.sqrt %159 : vector<8x128xf32>
    %161 = math.absf %145 : vector<8x128xf32>
    %162 = arith.cmpf ogt, %160, %161 : vector<8x128xf32>
    %cst_37 = arith.constant 0.899999976 : f32
    %163 = vector.broadcast %cst_37 : f32 to vector<8x128xf32>
    %164 = arith.mulf %163, %160 : vector<8x128xf32>
    %cst_38 = arith.constant 1.000000e+00 : f32
    %165 = vector.broadcast %cst_38 : f32 to vector<8x128xf32>
    %166 = arith.addf %165, %159 : vector<8x128xf32>
    %167 = math.sqrt %166 : vector<8x128xf32>
    %168 = arith.select %162, %164, %167 : vector<8x128xi1>, vector<8x128xf32>
    %c0_39 = arith.constant 0 : index
    %c0_40 = arith.constant 0 : index
    %c0_41 = arith.constant 0 : index
    %169 = vector.load %arg3[%c0_39, %c0_40, %c0_41] : memref<4x8x128xf32, #tpu.memory_space<vmem>>, vector<1x8x128xf32>
    %170 = vector.shape_cast %169 : vector<1x8x128xf32> to vector<8x128xf32>
    %171 = vector.shape_cast %168 : vector<8x128xf32> to vector<1x8x128xf32>
    tpu.vector_store %arg3[%c0_39, %c0_40, %c0_41], %171 {strides = array<i32>} : memref<4x8x128xf32, #tpu.memory_space<vmem>>, vector<1x8x128xf32>,
    %c1_42 = arith.constant 1 : index
    %c0_43 = arith.constant 0 : index
    %c0_44 = arith.constant 0 : index
    %172 = vector.load %arg3[%c1_42, %c0_43, %c0_44] : memref<4x8x128xf32, #tpu.memory_space<vmem>>, vector<1x8x128xf32>
    %173 = vector.shape_cast %172 : vector<1x8x128xf32> to vector<8x128xf32>
    %174 = vector.shape_cast %148 : vector<8x128xf32> to vector<1x8x128xf32>
    tpu.vector_store %arg3[%c1_42, %c0_43, %c0_44], %174 {strides = array<i32>} : memref<4x8x128xf32, #tpu.memory_space<vmem>>, vector<1x8x128xf32>,
    %c2_45 = arith.constant 2 : index
    %c0_46 = arith.constant 0 : index
    %c0_47 = arith.constant 0 : index
    %175 = vector.load %arg3[%c2_45, %c0_46, %c0_47] : memref<4x8x128xf32, #tpu.memory_space<vmem>>, vector<1x8x128xf32>
    %176 = vector.shape_cast %175 : vector<1x8x128xf32> to vector<8x128xf32>
    %177 = vector.shape_cast %151 : vector<8x128xf32> to vector<1x8x128xf32>
    tpu.vector_store %arg3[%c2_45, %c0_46, %c0_47], %177 {strides = array<i32>} : memref<4x8x128xf32, #tpu.memory_space<vmem>>, vector<1x8x128xf32>,
    %c3_48 = arith.constant 3 : index
    %c0_49 = arith.constant 0 : index
    %c0_50 = arith.constant 0 : index
    %178 = vector.load %arg3[%c3_48, %c0_49, %c0_50] : memref<4x8x128xf32, #tpu.memory_space<vmem>>, vector<1x8x128xf32>
    %179 = vector.shape_cast %178 : vector<1x8x128xf32> to vector<8x128xf32>
    %180 = vector.shape_cast %154 : vector<8x128xf32> to vector<1x8x128xf32>
    tpu.vector_store %arg3[%c3_48, %c0_49, %c0_50], %180 {strides = array<i32>} : memref<4x8x128xf32, #tpu.memory_space<vmem>>, vector<1x8x128xf32>,
    return
  }
  func.func @transform_0(%arg0: i32) -> (i32, i32, i32) {
    %c0_i32 = arith.constant 0 : i32
    %c0_i32_0 = arith.constant 0 : i32
    %c0_i32_1 = arith.constant 0 : i32
    return %c0_i32, %arg0, %c0_i32_0 : i32, i32, i32
  }
  func.func @transform_1(%arg0: i32) -> (i32, i32, i32) {
    %c0_i32 = arith.constant 0 : i32
    %c0_i32_0 = arith.constant 0 : i32
    %c0_i32_1 = arith.constant 0 : i32
    return %c0_i32, %arg0, %c0_i32_0 : i32, i32, i32
  }
  func.func @transform_2(%arg0: i32) -> (i32, i32, i32) {
    %c0_i32 = arith.constant 0 : i32
    %c0_i32_0 = arith.constant 0 : i32
    %c0_i32_1 = arith.constant 0 : i32
    return %c0_i32, %arg0, %c0_i32_0 : i32, i32, i32
  }
}

</mosaic_0001>

<bundles_post_ra>
// kernel: tpu_custom_call.1
= control target key start
LH: loop header
LB: loop body
LE: loop exit
PB: predicated region body
PF: predicated region fallthrough
CT: control target
= control target key end

     0   :  { %7 = vsyncpa [#allocation3], 0  ;;  %s444_s0 = inlined_call_operand.hbm [shape: f32[4,8,128], index: 0, kind: input, shape index: {}]   ;;  %s445_s1 = inlined_call_operand.hbm [shape: f32[4,8,128], index: 1, kind: input, shape index: {}]   ;;  %s446_s2 = inlined_call_operand.hbm [shape: f32[4,8,128], index: 2, kind: output, shape index: {}]  }
   0x1   :  { %8 = vsyncpa [#allocation6], 0 }
   0x2   :  { %9 = vsyncpa [#allocation4], 0  ;;  %s355_s9 = smov [#allocation2]   ;;  %s283_s13 = scalar_lea.hbm %s444_s0, 512 }
   0x3   :  { %s15_s10 = sshll.u32 %s355_s9, 4  ;;  %p284_p0 = scmp.ne.s32.totalorder %s444_s0, %s283_s13  ;;  %s16_s10 = int_to_ptr.vmem [resolvable:$true] %s15_s10 }
   0x4   :  { %p287_p1 = scmp.lt.u32.totalorder %s283_s13, %s444_s0 }
   0x6   :  { %p289_p2 = pnand %p287_p1, %p284_p0 }
   0x8   :  { %292 = shalt.err (!%p289_p2)
}
   0x9   :  { %s293_s18 = scalar_lea.vmem %s16_s10, 512  ;;  %p298_p4 = scmp.lt.s32.totalorder %s16_s10, %s16_s10 }
   0xa   :  { %p294_p3 = scmp.ne.s32.totalorder %s16_s10, %s293_s18  ;;  %p299_p5 = scmp.lt.s32.totalorder %s293_s18, %s293_s18 }
   0xc   :  { %p300_p6 = por %p299_p5, %p298_p4 }
   0xe   :  { %p301_p7 = pnand %p300_p6, %p294_p3 }
  0x10   :  { %304 = shalt.err (!%p301_p7)
}
  0x11   :  { %s356_s19 = smov 128   ;;  %s357_s20 = smov 8  }
  0x12   :  { %21 = dma.hbm_to_vmem [thread:$0]  %s444_s0, 512, %s16_s10, [#allocation3], %s356_s19, %s356_s19, %s357_s20  }
  0x13   :  { %s358_s23 = smov [#allocation5]   ;;  %s305_s27 = scalar_lea.hbm %s445_s1, 512 }
  0x14   :  { %s27_s24 = sshll.u32 %s358_s23, 4  ;;  %p306_p8 = scmp.ne.s32.totalorder %s445_s1, %s305_s27  ;;  %s28_s24 = int_to_ptr.vmem [resolvable:$true] %s27_s24 }
  0x15   :  { %p309_p9 = scmp.lt.u32.totalorder %s305_s27, %s445_s1 }
  0x17   :  { %p311_p10 = pnand %p309_p9, %p306_p8 }
  0x19   :  { %314 = shalt.err (!%p311_p10)
}
  0x1a   :  { %s315_s4 = scalar_lea.vmem %s28_s24, 512  ;;  %p320_p12 = scmp.lt.s32.totalorder %s28_s24, %s28_s24 }
  0x1b   :  { %p316_p11 = scmp.ne.s32.totalorder %s28_s24, %s315_s4  ;;  %p321_p13 = scmp.lt.s32.totalorder %s315_s4, %s315_s4 }
  0x1d   :  { %p322_p0 = por %p321_p13, %p320_p12 }
  0x1f   :  { %p323_p1 = pnand %p322_p0, %p316_p11 }
  0x21   :  { %326 = shalt.err (!%p323_p1)
}
  0x22   :  { %33 = dma.hbm_to_vmem [thread:$0]  %s445_s1, 512, %s28_s24, [#allocation6], %s356_s19, %s356_s19, %s357_s20  }
  0x23   :  { %349 = dma.done.wait [#allocation3], 512  }
  0x24   :  { %350 = vsyncadd [#allocation3], 4294966784 }
  0x25   :  { %351 = dma.done.wait [#allocation6], 512  }
  0x26   :  { %352 = vsyncadd [#allocation6], 4294966784  ;;  %v405_v0 = vld [vmem:[#allocation2 + $0x8] sm:$0xff]  ;;  %v407_v1 = vld [vmem:[#allocation2 + $0x10] sm:$0xff]  ;;  %s359_s1 = smov [#allocation7]  }
  0x27   :  { %v409_v2 = vld [vmem:[#allocation2 + $0x18] sm:$0xff]  ;;  %v54_v3 = vmul.f32 %v405_v0, %v405_v0  ;;  %v55_v4 = vmul.f32 %v407_v1, %v407_v1  ;;  %v40_v9 = vld [vmem:[#allocation2] sm:$0xff]  ;;  %v49_v32 = vld [vmem:[#allocation5 + $0x8] sm:$0xff]  ;;  %s239_s6 = sshll.u32 %s359_s1, 4  ;;  %s240_s6 = int_to_ptr.vmem [resolvable:$true] %s239_s6 }
  0x28   :  { %v57_v5 = vmul.f32 %v409_v2, %v409_v2  ;;  %v66_v13 = vand.u32 2147483647, %v40_v9  ;;  %v51_v33 = vld [vmem:[#allocation5 + $0x10] sm:$0xff]  ;;  %v101_v34 = vmul.f32 %v49_v32, %v49_v32  ;;  %v53_v36 = vld [vmem:[#allocation5 + $0x18] sm:$0xff]  ;;  %v47_v39 = vld [vmem:[#allocation5] sm:$0xff]  ;;  %s327_s7 = scalar_lea.vmem %s240_s6, 512  ;;  %p332_p3 = scmp.lt.s32.totalorder %s240_s6, %s240_s6 }
  0x29   :  { %v56_v6 = vadd.f32 %v55_v4, %v54_v3  ;;  %v102_v35 = vmul.f32 %v51_v33, %v51_v33  ;;  %v104_v38 = vmul.f32 %v53_v36, %v53_v36  ;;  %v113_v46 = vmul.f32 %v47_v39, %v47_v39  ;;  %p328_p2 = scmp.ne.s32.totalorder %s240_s6, %s327_s7  ;;  %p333_p4 = scmp.lt.s32.totalorder %s327_s7, %s327_s7 }
  0x2b   :  { %v58_v7 = vadd.f32 %v57_v5, %v56_v6  ;;  %v103_v37 = vadd.f32 %v102_v35, %v101_v34  ;;  %p334_p5 = por %p333_p4, %p332_p3 }
  0x2d   :  { %257 = vrsqrt.f32 %v58_v7  ;;  %v69_v8 = vadd.f32 1.0, %v58_v7  ;;  %vm61_vm0 = vcmp.eq.f32.partialorder %v58_v7, inf  ;;  %v64_v11 = vand.u32 2147483648, %v58_v7  ;;  %p335_p6 = pnand %p334_p5, %p328_p2 }
  0x2e   :  { %vm63_vm1 = vcmp.eq.f32.partialorder %v58_v7, 0.0  ;;  %v105_v45 = vadd.f32 %v104_v38, %v103_v37 }
  0x2f   :  { %259 = vrsqrt.f32 %v69_v8  ;;  %vm72_vm2 = vcmp.eq.f32.partialorder %v69_v8, inf  ;;  %v75_v16 = vand.u32 2147483648, %v69_v8  ;;  %vm74_vm3 = vcmp.eq.f32.partialorder %v69_v8, 0.0 }
  0x30   :  { %vm114_vm8 = vcmp.gt.f32.partialorder %v105_v45, %v113_v46 }
  0x37   :  { %v258_v10 = vpop.eup %257 }
  0x38   :  { %v60_v12 = vmul.f32 %v258_v10, %v58_v7 }
  0x39   :  { %v260_v14 = vpop.eup %259 }
  0x3a   :  { %v62_v15 = vsel %vm61_vm0, %v58_v7, %v60_v12  ;;  %v71_v18 = vmul.f32 %v260_v14, %v69_v8 }
  0x3b   :  { %v65_v17 = vsel %vm63_vm1, %v64_v11, %v62_v15 }
  0x3c   :  { %vm67_vm4 = vcmp.gt.f32.partialorder %v65_v17, %v66_v13  ;;  %v68_v19 = vmul.f32 0.9, %v65_v17  ;;  %v73_v20 = vsel %vm72_vm2, %v69_v8, %v71_v18 }
  0x3d   :  { %v76_v21 = vsel %vm74_vm3, %v75_v16, %v73_v20 }
  0x3e   :  { %v417_v22 = vsel %vm67_vm4, %v68_v19, %v76_v21 }
  0x3f   :  { %v78_v23 = vmul.f32 %v417_v22, %v417_v22 }
  0x41   :  { %vm79_vm5 = vcmp.gt.f32.partialorder %v58_v7, %v78_v23  ;;  %v80_v24 = vsub.f32 %v58_v7, %v78_v23 }
  0x43   :  { %v81_v25 = vsel %vm79_vm5, %v58_v7, %v80_v24 }
  0x44   :  { %v82_v26 = vand.u32 2147483647, %v81_v25 }
  0x46   :  { %261 = vrsqrt.f32 %v82_v26  ;;  %vm85_vm6 = vcmp.eq.f32.partialorder %v82_v26, inf  ;;  %v88_v28 = vand.u32 2147483648, %v82_v26  ;;  %vm87_vm7 = vcmp.eq.f32.partialorder %v82_v26, 0.0 }
  0x50   :  { %v262_v27 = vpop.eup %261 }
  0x51   :  { %v84_v29 = vmul.f32 %v262_v27, %v82_v26 }
  0x53   :  { %v86_v30 = vsel %vm85_vm6, %v82_v26, %v84_v29 }
  0x54   :  { %v89_v31 = vsel %vm87_vm7, %v88_v28, %v86_v30 }
  0x55   :  { %263 = vrcp.f32 %v89_v31 }
  0x5f   :  { %v264_v40 = vpop.eup %263 }
  0x60   :  { %v92_v41 = vmul.f32 %v264_v40, %v417_v22  ;;  %v93_v42 = vmul.f32 %v264_v40, %v405_v0  ;;  %v94_v43 = vmul.f32 %v264_v40, %v407_v1  ;;  %v95_v44 = vmul.f32 %v264_v40, %v409_v2 }
  0x62   :  { %v96_v47 = vmul.f32 %v93_v42, %v93_v42  ;;  %v97_v48 = vmul.f32 %v94_v43, %v94_v43  ;;  %v99_v49 = vmul.f32 %v95_v44, %v95_v44  ;;  %v106_v50 = vmul.f32 %v93_v42, %v49_v32 }
  0x63   :  { %v107_v51 = vmul.f32 %v94_v43, %v51_v33  ;;  %v109_v52 = vmul.f32 %v95_v44, %v53_v36  ;;  %v111_v54 = vmul.f32 %v92_v41, %v92_v41  ;;  %v116_v56 = vmul.f32 %v92_v41, %v47_v39 }
  0x64   :  { %v98_v53 = vadd.f32 %v97_v48, %v96_v47 }
  0x65   :  { %v108_v55 = vadd.f32 %v107_v51, %v106_v50 }
  0x66   :  { %v100_v57 = vadd.f32 %v99_v49, %v98_v53 }
  0x67   :  { %v110_v58 = vadd.f32 %v109_v52, %v108_v55 }
  0x68   :  { %vm112_vm9 = vcmp.gt.f32.partialorder %v100_v57, %v111_v54 }
  0x69   :  { %vm115_vm10 = vmand %vm112_vm9, %vm114_vm8  ;;  %v117_v59 = vsub.f32 %v110_v58, %v116_v56 }
  0x6b   :  { %v118_v60 = vsel %vm115_vm10, %v110_v58, %v117_v59 }
  0x6c   :  { %v119_v61 = vmul.f32 %v118_v60, %v93_v42  ;;  %v121_v62 = vmul.f32 %v118_v60, %v94_v43  ;;  %v123_v63 = vmul.f32 %v118_v60, %v95_v44 }
  0x6e   :  { %v120_v3 = vadd.f32 %v119_v61, %v49_v32  ;;  %v122_v4 = vadd.f32 %v121_v62, %v51_v33  ;;  %v124_v5 = vadd.f32 %v123_v63, %v53_v36 }
  0x70   :  { %v125_v6 = vmul.f32 %v120_v3, %v120_v3  ;;  %v126_v7 = vmul.f32 %v122_v4, %v122_v4  ;;  %v128_v8 = vmul.f32 %v124_v5, %v124_v5 }
  0x72   :  { %v127_v9 = vadd.f32 %v126_v7, %v125_v6 }
  0x74   :  { %v129_v10 = vadd.f32 %v128_v8, %v127_v9 }
  0x76   :  { %265 = vrsqrt.f32 %v129_v10  ;;  %vm132_vm11 = vcmp.eq.f32.partialorder %v129_v10, inf  ;;  %v135_v12 = vand.u32 2147483648, %v129_v10  ;;  %vm134_vm12 = vcmp.eq.f32.partialorder %v129_v10, 0.0 }
  0x80   :  { %v266_v11 = vpop.eup %265 }
  0x81   :  { %v131_v13 = vmul.f32 %v266_v11, %v129_v10 }
  0x83   :  { %v133_v14 = vsel %vm132_vm11, %v129_v10, %v131_v13 }
  0x84   :  { %v136_v15 = vsel %vm134_vm12, %v135_v12, %v133_v14 }
  0x85   :  { %v137_v16 = vmax.f32 %v136_v15, 1e-07 }
  0x87   :  { %267 = vrcp.f32 %v137_v16 }
  0x88   :  { %269 = vrcp.f32 %v92_v41 }
  0x91   :  { %v268_v17 = vpop.eup %267 }
  0x92   :  { %v140_v18 = vmul.f32 %v268_v17, %v120_v3  ;;  %v141_v19 = vmul.f32 %v268_v17, %v122_v4  ;;  %v142_v20 = vmul.f32 %v268_v17, %v124_v5  ;;  %v270_v29 = vpop.eup %269 }
  0x94   :  { %v143_v21 = vmul.f32 %v140_v18, %v93_v42  ;;  %v144_v23 = vmul.f32 %v141_v19, %v94_v43  ;;  %v146_v24 = vmul.f32 %v142_v20, %v95_v44  ;;  %v150_v25 = vmul.f32 %v140_v18, %v140_v18 }
  0x95   :  { %v151_v26 = vmul.f32 %v141_v19, %v141_v19  ;;  %v153_v28 = vmul.f32 %v142_v20, %v142_v20 }
  0x96   :  { %v145_v27 = vadd.f32 %v144_v23, %v143_v21 }
  0x97   :  { %v152_v30 = vadd.f32 %v151_v26, %v150_v25 }
  0x98   :  { %v147_v31 = vadd.f32 %v146_v24, %v145_v27 }
  0x99   :  { %v154_v33 = vadd.f32 %v153_v28, %v152_v30 }
  0x9a   :  { %v149_v32 = vmul.f32 %v270_v29, %v147_v31 }
  0x9c   :  { %v155_v34 = vmul.f32 %v149_v32, %v149_v32 }
  0x9e   :  { %vm156_vm13 = vcmp.gt.f32.partialorder %v154_v33, %v155_v34  ;;  %v157_v35 = vsub.f32 %v154_v33, %v155_v34 }
  0xa0   :  { %v158_v36 = vsel %vm156_vm13, %v154_v33, %v157_v35 }
  0xa1   :  { %v159_v37 = vmax.f32 %v158_v36, 1e-12 }
  0xa3   :  { %271 = vrsqrt.f32 %v159_v37  ;;  %vm162_vm14 = vcmp.eq.f32.partialorder %v159_v37, inf  ;;  %v165_v39 = vand.u32 2147483648, %v159_v37  ;;  %vm164_vm15 = vcmp.eq.f32.partialorder %v159_v37, 0.0 }
  0xad   :  { %v272_v38 = vpop.eup %271 }
  0xae   :  { %v161_v40 = vmul.f32 %v272_v38, %v159_v37 }
  0xb0   :  { %v163_v41 = vsel %vm162_vm14, %v159_v37, %v161_v40 }
  0xb1   :  { %v166_v42 = vsel %vm164_vm15, %v165_v39, %v163_v41 }
  0xb2   :  { %v167_v43 = vmax.f32 %v166_v42, 1e-07 }
  0xb4   :  { %v168_v44 = vmin.f32 %v167_v43, 5.0 }
  0xb6   :  { %v169_v45 = vmul.f32 1.442695, %v168_v44  ;;  %v171_v46 = vsub.f32 0.0, %v168_v44  ;;  %v176_v47 = vmul.f32 %v168_v44, %v168_v44  ;;  %vm189_vm0 = vcmp.lt.f32.partialorder %v168_v44, 0.5 }
  0xb8   :  { %273 = vpow2.f32 %v169_v45  ;;  %v172_v48 = vmul.f32 1.442695, %v171_v46  ;;  %v178_v49 = vmul.f32 0.05, %v176_v47  ;;  %v179_v50 = vmul.f32 0.023809524, %v176_v47 }
  0xb9   :  { %v177_v53 = vmul.f32 0.16666667, %v176_v47 }
  0xba   :  { %275 = vpow2.f32 %v172_v48  ;;  %v180_v51 = vadd.f32 1.0, %v179_v50 }
  0xbb   :  { %277 = vrcp.f32 %v168_v44 }
  0xbc   :  { %v181_v52 = vmul.f32 %v180_v51, %v178_v49 }
  0xbe   :  { %v182_v54 = vadd.f32 1.0, %v181_v52 }
  0xc0   :  { %v183_v56 = vmul.f32 %v182_v54, %v177_v53 }
  0xc2   :  { %v274_v55 = vpop.eup %273  ;;  %v184_v62 = vadd.f32 1.0, %v183_v56 }
  0xc4   :  { %v276_v57 = vpop.eup %275 }
  0xc5   :  { %v174_v58 = vadd.f32 %v276_v57, %v274_v55  ;;  %v185_v59 = vsub.f32 %v274_v55, %v276_v57  ;;  %v278_v60 = vpop.eup %277 }
  0xc7   :  { %v175_v61 = vmul.f32 0.5, %v174_v58  ;;  %v186_v63 = vmul.f32 0.5, %v185_v59 }
  0xc9   :  { %v188_v3 = vmul.f32 %v278_v60, %v186_v63  ;;  %v194_v4 = vmul.f32 %v175_v61, %v405_v0  ;;  %v197_v5 = vmul.f32 %v175_v61, %v407_v1  ;;  %v200_v6 = vmul.f32 %v175_v61, %v409_v2 }
  0xca   :  { %v191_v1 = vmul.f32 %v175_v61, %v417_v22 }
  0xcb   :  { %v190_v7 = vsel %vm189_vm0, %v184_v62, %v188_v3 }
  0xcc   :  { %v195_v8 = vmul.f32 %v190_v7, %v140_v18  ;;  %v198_v9 = vmul.f32 %v190_v7, %v141_v19  ;;  %v201_v10 = vmul.f32 %v190_v7, %v142_v20  ;;  %v192_v2 = vmul.f32 %v190_v7, %v149_v32 }
  0xce   :  { %v196_v11 = vadd.f32 %v195_v8, %v194_v4  ;;  %v199_v12 = vadd.f32 %v198_v9, %v197_v5  ;;  %v202_v13 = vadd.f32 %v201_v10, %v200_v6  ;;  %v193_v18 = vadd.f32 %v192_v2, %v191_v1 }
  0xd0   :  { %v203_v14 = vmul.f32 %v196_v11, %v196_v11  ;;  %v204_v15 = vmul.f32 %v199_v12, %v199_v12  ;;  %v206_v16 = vmul.f32 %v202_v13, %v202_v13  ;;  %229 = vst [vmem:[#allocation7 + $0x8] sm:$0xff] %v196_v11  ;;  %231 = vst [vmem:[#allocation7 + $0x10] sm:$0xff] %v199_v12  ;;  %v215_v24 = vand.u32 2147483647, %v193_v18 }
  0xd1   :  { %233 = vst [vmem:[#allocation7 + $0x18] sm:$0xff] %v202_v13 }
  0xd2   :  { %v205_v17 = vadd.f32 %v204_v15, %v203_v14 }
  0xd4   :  { %v207_v21 = vadd.f32 %v206_v16, %v205_v17 }
  0xd6   :  { %279 = vrsqrt.f32 %v207_v21  ;;  %v218_v0 = vadd.f32 1.0, %v207_v21  ;;  %vm210_vm1 = vcmp.eq.f32.partialorder %v207_v21, inf  ;;  %v213_v20 = vand.u32 2147483648, %v207_v21 }
  0xd7   :  { %vm212_vm2 = vcmp.eq.f32.partialorder %v207_v21, 0.0 }
  0xd8   :  { %281 = vrsqrt.f32 %v218_v0  ;;  %vm221_vm3 = vcmp.eq.f32.partialorder %v218_v0, inf  ;;  %v224_v27 = vand.u32 2147483648, %v218_v0  ;;  %vm223_vm4 = vcmp.eq.f32.partialorder %v218_v0, 0.0 }
  0xe0   :  { %v280_v19 = vpop.eup %279 }
  0xe1   :  { %v209_v23 = vmul.f32 %v280_v19, %v207_v21 }
  0xe2   :  { %v282_v25 = vpop.eup %281 }
  0xe3   :  { %v211_v26 = vsel %vm210_vm1, %v207_v21, %v209_v23  ;;  %v220_v29 = vmul.f32 %v282_v25, %v218_v0 }
  0xe4   :  { %v214_v28 = vsel %vm212_vm2, %v213_v20, %v211_v26 }
  0xe5   :  { %vm216_vm5 = vcmp.gt.f32.partialorder %v214_v28, %v215_v24  ;;  %v217_v22 = vmul.f32 0.9, %v214_v28  ;;  %v222_v30 = vsel %vm221_vm3, %v218_v0, %v220_v29 }
  0xe6   :  { %v225_v31 = vsel %vm223_vm4, %v224_v27, %v222_v30 }
  0xe7   :  { %v226_v32 = vsel %vm216_vm5, %v217_v22, %v225_v31 }
  0xe8   :  { %227 = vst [vmem:[#allocation7] sm:$0xff] %v226_v32 }
  0xe9   :  { %338 = shalt.err (!%p335_p6)
}
  0xea   :  { %s339_s10 = scalar_lea.hbm %s446_s2, 512 }
  0xeb   :  { %p340_p7 = scmp.ne.s32.totalorder %s446_s2, %s339_s10  ;;  %p343_p8 = scmp.lt.u32.totalorder %s339_s10, %s446_s2 }
  0xed   :  { %p345_p9 = pnand %p343_p8, %p340_p7 }
  0xef   :  { %348 = shalt.err (!%p345_p9)
}
  0xf0   :  { %245 = dma.vmem_to_hbm [thread:$0]  %s240_s6, 512, %s446_s2, [#allocation4], %s356_s19, %s356_s19, %s357_s20  }
  0xf1   :  { %353 = dma.done.wait [#allocation4], 512  }
  0xf2   :  { %354 = vsyncadd [#allocation4], 4294966784 }
  0xf3   :  { %249 = vsyncpa [#allocation3], 1 }
  0xf4   :  { %250 = vsyncpa [#allocation6], 1 }
  0xf5   :  { %251 = vsyncpa [#allocation4], 1 }

</bundles_post_ra>
